<compile_context>
chip_gen: v5e
topology: v5e:2x2
jax: 0.10.0
libtpu: 0.0.40
codegen_flags: <defaults>
</compile_context>

<pallas_src>
import functools
import math

import jax
import jax.numpy as jnp
from jax import lax
from jax.experimental import pallas as pl
from jax.experimental.pallas import tpu as pltpu

_MASK_VALUE = -1e30  # finite sentinel: exp(_MASK_VALUE - m) underflows to 0


# ----------------------------------------------------------------------------
# Kernel bodies
# ----------------------------------------------------------------------------

def _attend(q, k, v, mask_bool, ctx_ref, attn_ref, *, inv_sqrt_dim, mm_dtype,
            approx_reciprocal):
    """Score -> softmax -> context for one (tq, Tk) tile."""
    qd = (q * inv_sqrt_dim).astype(mm_dtype)     # fold 1/sqrt(dim) into Q (tq*D mul)
    kd = k.astype(mm_dtype)

    # 'NT' matmul: contract last dims, no K transpose / XLU relayout materialized.
    score = lax.dot_general(
        qd, kd,
        dimension_numbers=(((1,), (1,)), ((), ())),
        preferred_element_type=jnp.float32,
    )                                            # (tq, Tk) f32

    if mask_bool is not None:
        # torch masked_fill_(mask, -inf); finite sentinel avoids NaN rows.
        score = jnp.where(mask_bool, _MASK_VALUE, score)

    # numerically-stable softmax along the last axis (matches F.softmax(score, -1))
    m = jnp.max(score, axis=-1, keepdims=True)
    p = jnp.exp(score - m)
    denom = jnp.sum(p, axis=-1, keepdims=True)
    if approx_reciprocal:
        attn = p * pl.reciprocal(denom, approx=True)   # EUP slot, ~1e-3 error
    else:
        attn = p / denom                               # exact: rows sum to 1

    # second matmul: probabilities in matmul dtype, f32 accumulate on the MXU
    ctx = jnp.dot(attn.astype(mm_dtype), v.astype(mm_dtype),
                  preferred_element_type=jnp.float32)

    attn_ref[0] = attn.astype(attn_ref.dtype)
    ctx_ref[0] = ctx.astype(ctx_ref.dtype)


def _sdpa_kernel_nomask(q_ref, k_ref, v_ref, ctx_ref, attn_ref, *,
                        inv_sqrt_dim, mm_dtype, approx_reciprocal, causal):
    # Blocks: q (1, tq, D), k (1, Tk, D), v (1, Tk, Dv)
    q = q_ref[0]
    k = k_ref[0]
    v = v_ref[0]

    mask_bool = None
    if causal:
        # Generate the causal mask on the VPU instead of streaming it from HBM.
        tq, tk = q.shape[0], k.shape[0]
        row = pl.program_id(1) * tq + lax.broadcasted_iota(jnp.int32, (tq, tk), 0)
        col = lax.broadcasted_iota(jnp.int32, (tq, tk), 1)
        mask_bool = col > row

    _attend(q, k, v, mask_bool, ctx_ref, attn_ref,
            inv_sqrt_dim=inv_sqrt_dim, mm_dtype=mm_dtype,
            approx_reciprocal=approx_reciprocal)


def _sdpa_kernel_mask(q_ref, k_ref, v_ref, mask_ref, ctx_ref, attn_ref, *,
                      inv_sqrt_dim, mm_dtype, approx_reciprocal):
    # mask block (1, tq, Tk) int8, nonzero = masked (torch bool-mask semantics)
    _attend(q_ref[0], k_ref[0], v_ref[0], mask_ref[0] != 0, ctx_ref, attn_ref,
            inv_sqrt_dim=inv_sqrt_dim, mm_dtype=mm_dtype,
            approx_reciprocal=approx_reciprocal)


# ----------------------------------------------------------------------------
# VMEM-aware tiling policy
# ----------------------------------------------------------------------------

_Q_TILE_CANDIDATES = (512, 256, 128, 64, 32, 16, 8)


def _physical_vmem_bytes():
    try:
        return int(pltpu.get_tpu_info().vmem_capacity_bytes)
    except Exception:
        return 64 * 1024 * 1024   # conservative fallback = v7x per-TC VMEM


def _vmem_step_bytes(tq, Tk, D, Dv, in_bytes, attn_bytes, ctx_bytes, has_mask):
    """Per-grid-step VMEM footprint estimate (double-buffered blocks + f32 temps)."""
    kv = 2 * Tk * (D + Dv) * in_bytes          # K, V (double-buffered)
    qb = 2 * tq * D * in_bytes                 # Q
    cb = 2 * tq * Dv * ctx_bytes               # context out
    ab = 2 * tq * Tk * attn_bytes              # attn out (dominant write stream)
    mb = 2 * tq * Tk if has_mask else 0        # int8 mask
    tmp = 3 * tq * Tk * 4                      # f32 score / p / attn live together
    return kv + qb + cb + ab + mb + tmp


def _pick_q_tile(Tq, Tk, D, Dv, in_bytes, attn_bytes, ctx_bytes, has_mask, budget):
    """Largest query-tile that fits the VMEM budget and the (8,128)/int8 rules."""
    if Tq <= 8:
        return Tq                              # full dim is always a legal block
    cands = [c for c in _Q_TILE_CANDIDATES if c <= Tq]
    if has_mask:
        # int8 native sublane packing is (32,128): tq < 32 forces per-tile relayouts.
        big = [c for c in cands if c >= 32]
        if big:
            cands = big
    for tq in cands:
        if _vmem_step_bytes(tq, Tk, D, Dv, in_bytes, attn_bytes, ctx_bytes,
                            has_mask) <= budget:
            return tq
    # TODO(synk): if even the smallest tile plus the full-row K/V exceeds VMEM
    # (very long Tk on v7x's 64 MiB), restructure into a two-pass kernel tiled
    # over Tk (pass 1: row max + denom, pass 2: normalize + accumulate ctx).
    return cands[-1]


# ----------------------------------------------------------------------------
# Public wrapper
# ----------------------------------------------------------------------------

def scaled_dot_product_attention(query, key, value, mask=None, *, dim=None,
                                 is_causal=False, attn_dtype=None,
                                 matmul_in_bf16=False, approx_reciprocal=False):
    """Pallas TPU implementation of ScaledDotProductAttention.forward.

    query: (B, Tq, D), key: (B, Tk, D), value: (B, Tk, Dv)
    mask (optional): reshapable to (B, Tq, Tk); nonzero entries are masked out
      before softmax (torch masked_fill_ with -inf semantics, except a finite
      sentinel is used so fully-masked rows give a uniform row, not NaNs).
    is_causal: generate a causal mask in-kernel (mutually exclusive with mask);
      removes the (B, Tq, Tk) mask HBM stream entirely.
    attn_dtype: dtype of the returned attn matrix (default: query.dtype).
      bf16 halves the dominant HBM write stream on memory-bound shapes.
    matmul_in_bf16: run the two MXU matmuls with bf16 operands (f32 accumulate)
      even for f32 inputs; only worthwhile on compute-leaning shapes (v5e).
    approx_reciprocal: use the EUP approximate reciprocal for the softmax
      denominator (rows then sum to 1 only within ~1e-3).
    Returns (context (B, Tq, Dv), attn (B, Tq, Tk)).
    """
    B, Tq, D = query.shape
    Bk, Tk, Dk = key.shape
    Bv, Tkv, Dv = value.shape
    assert B == Bk == Bv and D == Dk and Tk == Tkv
    assert not (is_causal and mask is not None), "pass either `mask` or `is_causal`"

    if dim is None:
        dim = D                                          # module ctor default
    inv_sqrt_dim = 1.0 / math.sqrt(dim)

    in_dtype = query.dtype
    ctx_dtype = in_dtype
    attn_dtype = jnp.dtype(in_dtype if attn_dtype is None else attn_dtype)

    mm_dtype = in_dtype
    if matmul_in_bf16 and in_dtype == jnp.float32:
        mm_dtype = jnp.bfloat16

    in_bytes = jnp.dtype(in_dtype).itemsize
    ctx_bytes = jnp.dtype(ctx_dtype).itemsize
    attn_bytes = attn_dtype.itemsize
    has_mask = mask is not None

    # --- VMEM policy: explicit scoped limit + budget-aware query tile -------
    physical_vmem = _physical_vmem_bytes()
    vmem_limit = int(physical_vmem * 0.8)               # headroom for compiler scratch
    tq = _pick_q_tile(Tq, Tk, D, Dv, in_bytes, attn_bytes, ctx_bytes, has_mask,
                      budget=int(vmem_limit * 0.85))

    # v7x megacore: keep >= 2 grid steps on a 'parallel' axis when B == 1.
    if B == 1 and tq >= Tq and tq >= 16 and tq % 16 == 0:
        tq //= 2

    n_q = pl.cdiv(Tq, tq)
    Tq_pad = n_q * tq

    q_in = query
    mask_in = None
    if has_mask:
        assert mask.size == B * Tq * Tk, (
            f"mask has {mask.size} elements, expected {B * Tq * Tk} "
            f"(reshapable to {(B, Tq, Tk)})")
        mask_in = jnp.reshape(mask, (B, Tq, Tk)).astype(jnp.int8)  # 4x less HBM than int32
    if Tq_pad != Tq:
        pad = Tq_pad - Tq
        q_in = jnp.pad(q_in, ((0, 0), (0, pad), (0, 0)))
        if has_mask:
            mask_in = jnp.pad(mask_in, ((0, 0), (0, pad), (0, 0)))  # pad = unmasked

    out_shape = (
        jax.ShapeDtypeStruct((B, Tq_pad, Dv), ctx_dtype),   # context
        jax.ShapeDtypeStruct((B, Tq_pad, Tk), attn_dtype),  # attn
    )

    q_spec = pl.BlockSpec((1, tq, D), lambda b, qi: (b, qi, 0))
    # TODO(synk): on v7x consider pipeline_mode=pl.Buffered(1) for K/V (their
    # index_map is constant along qi) to halve their VMEM residency.
    k_spec = pl.BlockSpec((1, Tk, D), lambda b, qi: (b, 0, 0))
    v_spec = pl.BlockSpec((1, Tk, Dv), lambda b, qi: (b, 0, 0))
    ctx_spec = pl.BlockSpec((1, tq, Dv), lambda b, qi: (b, qi, 0))
    attn_spec = pl.BlockSpec((1, tq, Tk), lambda b, qi: (b, qi, 0))

    if has_mask:
        kernel = functools.partial(
            _sdpa_kernel_mask, inv_sqrt_dim=inv_sqrt_dim, mm_dtype=mm_dtype,
            approx_reciprocal=approx_reciprocal)
        mask_spec = pl.BlockSpec((1, tq, Tk), lambda b, qi: (b, qi, 0))
        in_specs = [q_spec, k_spec, v_spec, mask_spec]
        args = (q_in, key, value, mask_in)
    else:
        kernel = functools.partial(
            _sdpa_kernel_nomask, inv_sqrt_dim=inv_sqrt_dim, mm_dtype=mm_dtype,
            approx_reciprocal=approx_reciprocal, causal=is_causal)
        in_specs = [q_spec, k_spec, v_spec]
        args = (q_in, key, value)

    grid_spec = pltpu.PrefetchScalarGridSpec(
        num_scalar_prefetch=0,
        grid=(B, n_q),
        in_specs=in_specs,
        out_specs=(ctx_spec, attn_spec),
    )

    ctx, attn = pl.pallas_call(
        kernel,
        out_shape=out_shape,
        grid_spec=grid_spec,
        compiler_params=pltpu.CompilerParams(
            dimension_semantics=("parallel", "parallel"),
            vmem_limit_bytes=vmem_limit,
        ),
    )(*args)

    if Tq_pad != Tq:
        ctx = ctx[:, :Tq]
        attn = attn[:, :Tq]
    return ctx, attn


# ----------------------------------------------------------------------------
# Reference + self-test
# ----------------------------------------------------------------------------

def _reference(query, key, value, mask=None):
    # Plain-JAX reference mirroring the PyTorch forward.
    D = query.shape[-1]
    score = jnp.einsum("bqd,bkd->bqk", query, key) / math.sqrt(D)
    if mask is not None:
        score = jnp.where(jnp.reshape(mask, score.shape) != 0, -jnp.inf, score)
    attn = jax.nn.softmax(score, axis=-1)
    context = jnp.einsum("bqk,bkd->bqd", attn, value)
    return context, attn


if __name__ == "__main__":
    key0 = jax.random.PRNGKey(0)
    kq, kk, kv = jax.random.split(key0, 3)

    B, Tq, Tk, D, Dv = 2, 8, 8, 32, 32
    query = jax.random.normal(kq, (B, Tq, D), dtype=jnp.float32)
    keyt = jax.random.normal(kk, (B, Tk, D), dtype=jnp.float32)
    value = jax.random.normal(kv, (B, Tk, Dv), dtype=jnp.float32)

    # --- no-mask path ---
    ctx, attn = scaled_dot_product_attention(query, keyt, value)
    jax.block_until_ready((ctx, attn))
    ref_ctx, ref_attn = _reference(query, keyt, value)
    assert jnp.allclose(ctx, ref_ctx, atol=2e-3, rtol=2e-3)
    assert jnp.allclose(attn, ref_attn, atol=2e-3, rtol=2e-3)

    # --- explicit masked path (causal mask streamed as int8; never a fully-masked row)
    causal = (jnp.arange(Tk)[None, :] > jnp.arange(Tq)[:, None])
    mask = jnp.broadcast_to(causal, (B, Tq, Tk))
    ctx_m, attn_m = scaled_dot_product_attention(query, keyt, value, mask=mask)
    jax.block_until_ready((ctx_m, attn_m))
    ref_ctx_m, ref_attn_m = _reference(query, keyt, value, mask=mask)
    assert jnp.allclose(ctx_m, ref_ctx_m, atol=2e-3, rtol=2e-3)
    assert jnp.allclose(attn_m, ref_attn_m, atol=2e-3, rtol=2e-3)

    # --- in-kernel causal fast path (no mask HBM stream) ---
    ctx_c, attn_c = scaled_dot_product_attention(query, keyt, value, is_causal=True)
    jax.block_until_ready((ctx_c, attn_c))
    assert jnp.allclose(ctx_c, ref_ctx_m, atol=2e-3, rtol=2e-3)
    assert jnp.allclose(attn_c, ref_attn_m, atol=2e-3, rtol=2e-3)

    print("KERNEL_OK")
</pallas_src>

<mosaic_0001>
module attributes {stable_mosaic.version = 11 : i64} {
  func.func @_sdpa_kernel_nomask(%arg0: i32, %arg1: i32, %arg2: memref<1x8x32xf32, #tpu.memory_space<vmem>>, %arg3: memref<1x8x32xf32, #tpu.memory_space<vmem>>, %arg4: memref<1x8x32xf32, #tpu.memory_space<vmem>>, %arg5: memref<1x8x32xf32, #tpu.memory_space<vmem>>, %arg6: memref<1x8x8xf32, #tpu.memory_space<vmem>>) attributes {dimension_semantics = [#tpu.dimension_semantics<parallel>, #tpu.dimension_semantics<parallel>], iteration_bounds = array<i64: 2, 1>, scalar_prefetch = 0 : i64, scratch_operands = 0 : i64, tpu.core_type = #tpu.core_type<tc>, window_params = [{transform_indices = @transform_0, window_bounds = array<i64: 1, 8, 32>}, {transform_indices = @transform_1, window_bounds = array<i64: 1, 8, 32>}, {transform_indices = @transform_2, window_bounds = array<i64: 1, 8, 32>}, {transform_indices = @transform_3, window_bounds = array<i64: 1, 8, 32>}, {transform_indices = @transform_4, window_bounds = array<i64: 1, 8, 8>}]} {
    %c0 = arith.constant 0 : index
    %c0_0 = arith.constant 0 : index
    %c0_1 = arith.constant 0 : index
    %0 = vector.load %arg2[%c0, %c0_0, %c0_1] : memref<1x8x32xf32, #tpu.memory_space<vmem>>, vector<1x8x32xf32>
    %1 = vector.shape_cast %0 : vector<1x8x32xf32> to vector<8x32xf32>
    %c0_2 = arith.constant 0 : index
    %c0_3 = arith.constant 0 : index
    %c0_4 = arith.constant 0 : index
    %2 = vector.load %arg3[%c0_2, %c0_3, %c0_4] : memref<1x8x32xf32, #tpu.memory_space<vmem>>, vector<1x8x32xf32>
    %3 = vector.shape_cast %2 : vector<1x8x32xf32> to vector<8x32xf32>
    %c0_5 = arith.constant 0 : index
    %c0_6 = arith.constant 0 : index
    %c0_7 = arith.constant 0 : index
    %4 = vector.load %arg4[%c0_5, %c0_6, %c0_7] : memref<1x8x32xf32, #tpu.memory_space<vmem>>, vector<1x8x32xf32>
    %5 = vector.shape_cast %4 : vector<1x8x32xf32> to vector<8x32xf32>
    %cst = arith.constant 0.176776692 : f32
    %6 = vector.broadcast %cst : f32 to vector<8x32xf32>
    %7 = arith.mulf %1, %6 : vector<8x32xf32>
    %cst_8 = arith.constant dense<0.000000e+00> : vector<8x8xf32>
    %8 = tpu.matmul %7, %3, %cst_8 {dimension_numbers = #tpu.dot_dimension_numbers<[1], [1], [0], [0], [0, 0, 1, 0], [], []>} : vector<8x32xf32>, vector<8x32xf32>, vector<8x8xf32> -> vector<8x8xf32>
    %cst_9 = arith.constant dense<0xFF800000> : vector<8xf32>
    %9 = vector.multi_reduction <maximumf>, %8, %cst_9 [1] : vector<8x8xf32> to vector<8xf32>
    %10 = vector.shape_cast %9 : vector<8xf32> to vector<8x1xf32>
    %11 = vector.broadcast %10 : vector<8x1xf32> to vector<8x8xf32>
    %12 = arith.subf %8, %11 : vector<8x8xf32>
    %13 = math.exp %12 : vector<8x8xf32>
    %cst_10 = arith.constant dense<0.000000e+00> : vector<8xf32>
    %14 = vector.multi_reduction <add>, %13, %cst_10 [1] : vector<8x8xf32> to vector<8xf32>
    %15 = vector.shape_cast %14 : vector<8xf32> to vector<8x1xf32>
    %16 = vector.broadcast %15 : vector<8x1xf32> to vector<8x8xf32>
    %17 = arith.divf %13, %16 : vector<8x8xf32>
    %cst_11 = arith.constant dense<0.000000e+00> : vector<8x32xf32>
    %18 = tpu.matmul %17, %5, %cst_11 {dimension_numbers = #tpu.dot_dimension_numbers<[1], [0], [0], [1], [0, 0, 1, 1], [], []>} : vector<8x8xf32>, vector<8x32xf32>, vector<8x32xf32> -> vector<8x32xf32>
    %c0_12 = arith.constant 0 : index
    %c0_13 = arith.constant 0 : index
    %c0_14 = arith.constant 0 : index
    %19 = vector.load %arg6[%c0_12, %c0_13, %c0_14] : memref<1x8x8xf32, #tpu.memory_space<vmem>>, vector<1x8x8xf32>
    %20 = vector.shape_cast %19 : vector<1x8x8xf32> to vector<8x8xf32>
    %21 = vector.shape_cast %17 : vector<8x8xf32> to vector<1x8x8xf32>
    tpu.vector_store %arg6[%c0_12, %c0_13, %c0_14], %21 {strides = array<i32>} : memref<1x8x8xf32, #tpu.memory_space<vmem>>, vector<1x8x8xf32>,
    %c0_15 = arith.constant 0 : index
    %c0_16 = arith.constant 0 : index
    %c0_17 = arith.constant 0 : index
    %22 = vector.load %arg5[%c0_15, %c0_16, %c0_17] : memref<1x8x32xf32, #tpu.memory_space<vmem>>, vector<1x8x32xf32>
    %23 = vector.shape_cast %22 : vector<1x8x32xf32> to vector<8x32xf32>
    %24 = vector.shape_cast %18 : vector<8x32xf32> to vector<1x8x32xf32>
    tpu.vector_store %arg5[%c0_15, %c0_16, %c0_17], %24 {strides = array<i32>} : memref<1x8x32xf32, #tpu.memory_space<vmem>>, vector<1x8x32xf32>,
    return
  }
  func.func @transform_0(%arg0: i32, %arg1: i32) -> (i32, i32, i32) {
    %c0_i32 = arith.constant 0 : i32
    %c0_i32_0 = arith.constant 0 : i32
    return %arg0, %arg1, %c0_i32 : i32, i32, i32
  }
  func.func @transform_1(%arg0: i32, %arg1: i32) -> (i32, i32, i32) {
    %c0_i32 = arith.constant 0 : i32
    %c0_i32_0 = arith.constant 0 : i32
    %c0_i32_1 = arith.constant 0 : i32
    return %arg0, %c0_i32, %c0_i32_0 : i32, i32, i32
  }
  func.func @transform_2(%arg0: i32, %arg1: i32) -> (i32, i32, i32) {
    %c0_i32 = arith.constant 0 : i32
    %c0_i32_0 = arith.constant 0 : i32
    %c0_i32_1 = arith.constant 0 : i32
    return %arg0, %c0_i32, %c0_i32_0 : i32, i32, i32
  }
  func.func @transform_3(%arg0: i32, %arg1: i32) -> (i32, i32, i32) {
    %c0_i32 = arith.constant 0 : i32
    %c0_i32_0 = arith.constant 0 : i32
    return %arg0, %arg1, %c0_i32 : i32, i32, i32
  }
  func.func @transform_4(%arg0: i32, %arg1: i32) -> (i32, i32, i32) {
    %c0_i32 = arith.constant 0 : i32
    %c0_i32_0 = arith.constant 0 : i32
    return %arg0, %arg1, %c0_i32 : i32, i32, i32
  }
}

</mosaic_0001>

<bundles_post_ra>
// kernel: tpu_custom_call.1
= control target key start
LH: loop header
LB: loop body
LE: loop exit
PB: predicated region body
PF: predicated region fallthrough
CT: control target
= control target key end

     0   :  { %s1116_s0 = inlined_call_operand.hbm [shape: f32[2,8,32], index: 0, kind: input, shape index: {}]   ;;  %s1117_s1 = inlined_call_operand.hbm [shape: f32[2,8,32], index: 1, kind: input, shape index: {}]   ;;  %s1118_s2 = inlined_call_operand.hbm [shape: f32[2,8,32], index: 2, kind: input, shape index: {}]   ;;  %s1119_s3 = inlined_call_operand.hbm [shape: f32[2,8,32], index: 3, kind: output, shape index: {0}]   ;;  %s1120_s4 = inlined_call_operand.hbm [shape: f32[2,8,8], index: 4, kind: output, shape index: {1}]  }
   0x1   :  { %1124 = sst [smem:[#allocation19_spill]] %s1117_s1 }
   0x2   :  { %10 = vsyncpa [#allocation3], 0 }
   0x3   :  { %12 = vsyncpa [#allocation3 + $0x1], 0 }
   0x4   :  { %13 = vsyncpa [#allocation6], 0 }
   0x5   :  { %15 = vsyncpa [#allocation6 + $0x1], 0 }
   0x6   :  { %16 = vsyncpa [#allocation4], 0 }
   0x7   :  { %18 = vsyncpa [#allocation4 + $0x1], 0 }
   0x8   :  { %19 = vsyncpa [#allocation10], 0 }
   0x9   :  { %21 = vsyncpa [#allocation10 + $0x1], 0  ;;  %s936_s15 = smov 0   ;;  %s938_s16 = smov 0  }
   0xa   :  { %s940_s17 = smov 0   ;;  %s942_s18 = smov 0  }
   0xb   :  { %s944_s19 = smov 0   ;;  %s946_s20 = smov 0  }
   0xc LB: > { %1125 = sst [smem:[#allocation15_spill]] %s897_s17  ;;  %s967_s21 = sadd.s32 4294967295, %s909_s20   ;;  %s909_s20 = sphi %s946_s20, %s27_s20   ;;  %s905_s19 = sphi %s944_s19, %s1139_s19   ;;  %s901_s18 = sphi %s942_s18, %s1138_s18   ;;  %s897_s17 = sphi %s940_s17, %s1137_s17   ;;  %s893_s16 = sphi %s938_s16, %s1141_s16   ;;  %s889_s15 = sphi %s936_s15, %s1140_s15  }
   0xd   : > { %1126 = sst [smem:[#allocation16_spill]] %s905_s19  ;;  %s596_s22 = sadd.s32 4294967294, %s909_s20  }
   0xe   : > { %s39_s23 = sadd.s32 1, %s905_s19  ;;  %s48_s24 = sadd.s32 1, %s897_s17 }
   0xf   : > { %p41_p0 = scmp.ge.s32.totalorder %s39_s23, 2  ;;  %p55_p1 = scmp.ne.s32.totalorder %s897_s17, %s893_s16 }
  0x10   : > { %p56_p2 = scmp.eq.s32.totalorder %s909_s20, 0  ;;  %p61_p3 = scmp.ne.s32.totalorder %s893_s16, %s889_s15 }
  0x11   : > { %s1143_s23 = smov (%p41_p0, %s39_s23), 0  ;;  %p62_p5 = scmp.eq.s32.totalorder %s967_s21, 0 }
  0x12   : > { %1127 = sst [smem:[#allocation17_spill]] %s1143_s23  ;;  %p979_p4 = por %p56_p2, %p55_p1 }
  0x13   : > { %s43_s26 = ssub.s32 %s905_s19, %s1143_s23  ;;  %p139_p6 = scmp.eq.s32.totalorder %s967_s21, 1 }
  0x14   : > { %p46_p7 = scmp.eq.s32.totalorder %s43_s26, 0  ;;  %p987_p8 = por %p62_p5, %p61_p3 }
  0x15   : > { %p991_p9 = por %p139_p6, %p55_p1  ;;  %p145_p10 = scmp.eq.s32.totalorder %s596_s22, 1 }
  0x16   : > { %s996_s29 = scalar_select %p46_p7, %s897_s17, %s48_s24  }
  0x17   : > { %p998_p11 = por %p145_p10, %p61_p3  ;;  %p598_p12 = scmp.ge.s32.totalorder %s909_s20, 2 }
  0x18   : > { %1131 = sst [smem:[#allocation18_spill]] %s996_s29  ;;  %p647_p13 = scmp.lt.s32.totalorder %s909_s20, 2 }
  0x19   : > { %s193_s5 = sand.u32 1, %s897_s17   ;;  %s600_s7 = sshll.u32 %s905_s19, 3 }
  0x1a   : > { %s599_s6 = sshll.u32 %s193_s5, 3  ;;  %p1008_p0 = pnand %p647_p13, %p979_p4 }
  0x1b   : > { %s213_s9 = sand.u32 1, %s909_s20   ;;  %s1134_s1 = sld [smem:[#allocation19_spill]] }
  0x1c   : > { %s217_s14 = scalar_lea.vmem [#allocation5], %s599_s6  ;;  %s214_s24 = scalar_lea.sflag [#allocation6], %s213_s9 }
  0x1d   : > { %s225_s22 = sshll.u32 %s217_s14, 4  ;;  %p605_p1 = scmp.ge.s32.totalorder %s909_s20, 1  ;;  %s226_s22 = int_to_ptr.vmem [resolvable:$true] %s225_s22 }
  0x1e   : > { %p249_p2 = scmp.lt.s32.totalorder %s909_s20, 3  ;;  %s202_s10 = scalar_lea.hbm %s1116_s0, %s600_s7 }
  0x1f   : > { %s204_s11 = sshll.u32 %s202_s10, 4  ;;  %s194_s14 = scalar_lea.sflag [#allocation3], %s193_s5  ;;  %s205_s11 = int_to_ptr.hbm [resolvable:$true] %s204_s11 }
  0x20   : > { %p1020_p3 = pnand %p605_p1, %p249_p2  ;;  %s236_s29 = scalar_lea.vmem [#allocation7], %s599_s6 }
  0x21   : > { %s221_s12 = scalar_lea.hbm %s1134_s1, %s600_s7  ;;  %s244_s17 = sshll.u32 %s236_s29, 4  ;;  %s245_s17 = int_to_ptr.vmem [resolvable:$true] %s244_s17 }
  0x22   : > { %s223_s13 = sshll.u32 %s221_s12, 4  ;;  %s197_s12 = scalar_lea.vmem [#allocation2], %s599_s6  ;;  %s224_s13 = int_to_ptr.hbm [resolvable:$true] %s223_s13 }
  0x23   : > { %636 = dma.hbm_to_vmem [thread:$0]  (!%p1008_p0), %s224_s13, 128, %s226_s22, %s214_s24  }
  0x24   : > { %s206_s1 = sshll.u32 %s197_s12, 4  ;;  %s240_s22 = scalar_lea.hbm %s1118_s2, %s600_s7  ;;  %s207_s1 = int_to_ptr.vmem [resolvable:$true] %s206_s1 }
  0x25   : > { %633 = dma.hbm_to_vmem [thread:$0]  (!%p1008_p0), %s205_s11, 128, %s207_s1, %s194_s14  }
  0x26   : > { %s242_s19 = sshll.u32 %s240_s22, 4  ;;  %253 = sbr.rel (%p1020_p3) target bundleno = 570 (0x23a), region = 32  ;;  %s243_s19 = int_to_ptr.hbm [resolvable:$true] %s242_s19 }
  0x27   : > { %639 = dma.hbm_to_vmem [thread:$0]  (!%p1008_p0), %s243_s19, 128, %s245_s17, %s214_s24  }
  0x28   : > { %s1037_s23 = sand.u32 (!%p1020_p3), 1, %s893_s16  }
  0x29   : > { %s1040_s1 = sshll.u32 (!%p1020_p3), %s1037_s23, 3  ;;  %s256_s5 = scalar_lea.sflag (!%p1020_p3), [#allocation3], %s1037_s23 }
  0x2a   : > { %s259_s7 = scalar_lea.vmem (!%p1020_p3), [#allocation2], %s1040_s1 }
  0x2b   : > { %872 = dma.done.wait (%p987_p8), %s256_s5, 128  }
  0x2c   : > { %874 = vsyncadd (%p987_p8), %s256_s5, 4294967168  ;;  %s265_s17 = sand.u32 1, %s967_s21   ;;  %s269_s29 = scalar_lea.vmem [#allocation5], %s1040_s1 }
  0x2d   : > { %s266_s19 = scalar_lea.sflag [#allocation6], %s265_s17 }
  0x2e   : > { %876 = dma.done.wait (%p987_p8), %s266_s19, 256  }
  0x2f   : > { %878 = vsyncadd (%p987_p8), %s266_s19, 4294967040  ;;  %vm324_vm0 = vcmask 261120   ;;  %v321_v0 = vld [vmem:[%s269_s29] sm:$0xff]  ;;  %v320_v1 = vld [vmem:[%s259_s7] sm:$0xff]  ;;  %vm351_vm1 = vcmask 64512   ;;  %s279_s21 = scalar_lea.vmem [#allocation7], %s1040_s1 }
  0x30   : > { %611 = vmatpush.xpose.msk.msra.mxu0 %vm324_vm0, %v321_v0  ;;  %v323_v2 = vmul.f32 0.17677669, %v320_v1  ;;  %v322_v10 = vld [vmem:[%s279_s21] sm:$0xff]  ;;  %s616_s27 = sshll.u32 %s901_s18, 3  ;;  %s319_s25 = scalar_lea.vmem [#allocation9], %s1040_s1 }
  0x31   : > { %394 = vmatpush.msra.mxu1 %v322_v10  ;;  %s433_s24 = scalar_lea.hbm %s1120_s4, %s616_s27  ;;  %s435_s26 = sshll.u32 %s319_s25, 4  ;;  %s436_s26 = int_to_ptr.vmem [resolvable:$true] %s435_s26 }
  0x32   : > { %s437_s10 = sshll.u32 %s433_s24, 4  ;;  %s407_s11 = scalar_lea.sflag [#allocation10], %s1037_s23  ;;  %s438_s10 = int_to_ptr.hbm [resolvable:$true] %s437_s10 }
  0x33   : > { %612 = vmatmul.msk.f32.vlgmr.msra.gmra.mxu0 %vm324_vm0, %v323_v2  ;;  %s805_s18 = sshra.s32 %s438_s10, 4  ;;  %s811_s13 = scalar_lea.hbm %s1120_s4, 16  ;;  %s806_s18 = int_to_ptr.hbm [resolvable:$true] %s805_s18 }
  0x34   : > { %s807_s12 = scalar_lea.hbm %s806_s18, 8  ;;  %p812_p7 = scmp.lt.s32.totalorder %s806_s18, %s1120_s4 }
  0x35   : > { %p808_p4 = scmp.ne.s32.totalorder %s806_s18, %s807_s12  ;;  %p813_p8 = scmp.lt.s32.totalorder %s811_s13, %s807_s12 }
  0x37   : > { %p809_p5 = pnand %p808_p4, %p991_p9  ;;  %p814_p10 = por %p813_p8, %p812_p7 }
  0x39   : > { %p810_p6 = pneg %p809_p5 }
  0x3b   : > { %p815_p13 = pnand %p814_p10, %p810_p6 }
  0xb0   : > { %v348_v3 = vpop.f32.mrf.mxu0 }
  0xb1   : > { %v352_v4 = vsel %vm351_vm1, %v348_v3, -inf }
  0xb2   : > { %353 = vmax.xlane.f32.xlu0 %v352_v4 }
 0x125   : > { %v354_v5 = vpop.xlane.xlu0 %353 }
 0x126   : > { %v355_v6 = vsub.f32 %v348_v3, %v354_v5 }
 0x128   : > { %v356_v7 = vmul.f32 1.442695, %v355_v6 }
 0x12a   : > { %697 = vpow2.f32 %v356_v7 }
 0x130   : > { %v698_v8 = vpop.eup %697 }
 0x131   : > { %v358_v9 = vsel %vm351_vm1, %v698_v8, 0.0 }
 0x132   : > { %359 = vadd.xlane.f32.xlu0 %v358_v9 }
 0x1a5   : > { %v360_v11 = vpop.xlane.xlu0 %359 }
 0x1a6   : > { %699 = vrcp.f32 %v360_v11  ;;  %v372_v15 = vand.u32 2147483648, %v360_v11  ;;  %v370_v17 = vand.u32 2147483647, %v360_v11  ;;  %vm366_vm3 = vweird.f32 %v360_v11 }
 0x1a8   : > { %v373_v19 = vor.u32 1.1754944e-38, %v372_v15  ;;  %vm371_vm5 = vcmp.eq.f32.partialorder %v370_v17, 8.507059e+37 }
 0x1ac   : > { %v700_v12 = vpop.eup %699 }
 0x1ad   : > { %v362_v13 = vmul.f32 %v700_v12, %v360_v11  ;;  %vm367_vm2 = vweird.f32 %v700_v12 }
 0x1ae   : > { %vm368_vm4 = vmor %vm366_vm3, %vm367_vm2 }
 0x1af   : > { %v363_v14 = vsub.f32 1.0, %v362_v13 }
 0x1b1   : > { %v364_v16 = vmul.f32 %v700_v12, %v363_v14 }
 0x1b3   : > { %v365_v18 = vadd.f32 %v700_v12, %v364_v16 }
 0x1b5   : > { %v369_v20 = vsel %vm368_vm4, %v700_v12, %v365_v18 }
 0x1b6   : > { %v374_v21 = vsel %vm371_vm5, %v373_v19, %v369_v20 }
 0x1b7   : > { %v375_v22 = vmul.f32 %v698_v8, %v374_v21 }
 0x1b9   : > { %613 = vmatmul.msk.f32.vlgmr.msra.gmra.mxu1 %vm351_vm1, %v375_v22  ;;  %399 = vst.msk [vmem:[%s319_s25] sm:$0xff] %vm351_vm1, %v375_v22 }
 0x1ba   : > { %818 = shalt.err (!%p815_p13)
}
 0x1bb   : > { %627 = dma.vmem_to_hbm [thread:$0]  (%p991_p9), %s436_s26, 128, %s438_s10, %s407_s11  }
 0x1bc   : > { %s418_s19 = scalar_lea.hbm %s1119_s3, %s616_s27  ;;  %s312_s29 = scalar_lea.vmem [#allocation8], %s1040_s1 }
 0x1bd   : > { %s420_s21 = sshll.u32 %s312_s29, 4  ;;  %s422_s6 = sshll.u32 %s418_s19, 4  ;;  %s421_s21 = int_to_ptr.vmem [resolvable:$true] %s420_s21  ;;  %s423_s6 = int_to_ptr.hbm [resolvable:$true] %s422_s6 }
 0x1be   : > { %s402_s8 = scalar_lea.sflag [#allocation4], %s1037_s23  ;;  %s833_s24 = sshra.s32 %s423_s6, 4  ;;  %s834_s24 = int_to_ptr.hbm [resolvable:$true] %s833_s24 }
 0x1bf   : > { %s835_s25 = scalar_lea.hbm %s834_s24, 8  ;;  %s839_s27 = scalar_lea.hbm %s1119_s3, 16 }
 0x1c0   : > { %p836_p0 = scmp.ne.s32.totalorder %s834_s24, %s835_s25  ;;  %p840_p3 = scmp.lt.s32.totalorder %s834_s24, %s1119_s3 }
 0x1c1   : > { %p841_p4 = scmp.lt.s32.totalorder %s839_s27, %s835_s25 }
 0x1c2   : > { %p837_p1 = pnand %p836_p0, %p991_p9 }
 0x1c3   : > { %p842_p5 = por %p841_p4, %p840_p3 }
 0x1c4   : > { %p838_p2 = pneg %p837_p1 }
 0x1c6   : > { %p843_p6 = pnand %p842_p5, %p838_p2 }
 0x236   : > { %v396_v23 = vpop.f32.mrf.mxu1 }
 0x237   : > { %400 = vst.msk [vmem:[%s312_s29] sm:$0xff] %vm324_vm0, %v396_v23 }
 0x238   : > { %846 = shalt.err (!%p843_p6)
}
 0x239   : > { %626 = dma.vmem_to_hbm [thread:$0]  (%p991_p9), %s421_s21, 128, %s423_s6, %s402_s8  }
 0x23a PF: > { %s449_s23 = sand.u32 1, %s889_s15   ;;  %p641_p7 = pnand %p598_p12, %p998_p11 }
 0x23b   : > { %s450_s18 = scalar_lea.sflag [#allocation4], %s449_s23 }
 0x23c   : > { %p642_p8 = pneg %p641_p7 }
 0x23e   : > { %880 = dma.done.wait (%p642_p8), %s450_s18, 128  }
 0x23f   : > { %882 = vsyncadd (%p642_p8), %s450_s18, 4294967168  ;;  %s460_s12 = scalar_lea.sflag [#allocation10], %s449_s23 }
 0x240   : > { %884 = dma.done.wait (%p642_p8), %s460_s12, 128  }
 0x241   : > { %886 = vsyncadd (%p642_p8), %s460_s12, 4294967168  ;;  %s27_s20 = sadd.s32 1, %s909_s20   ;;  %s1136_s28 = sld [smem:[#allocation15_spill]] }
 0x242   : > { %p24_p10 = scmp.ge.s32.totalorder %s27_s20, 4   ;;  %s1137_s17 = sld [smem:[#allocation18_spill]] }
 0x243   : > { %s1138_s18 = sld [smem:[#allocation16_spill]]  ;;  %s1140_s15 = smov %s893_s16 }
 0x244   : > { %s1139_s19 = sld [smem:[#allocation17_spill]]  ;;  %26 = sbr.rel (!%p24_p10) target bundleno = 12 (0xc), region = 118 }
 0x247   : > { %s1141_s16 = smov %s1136_s28 }
 0x249   :  { %466 = vsyncpa [#allocation3], 1 }
 0x24a   :  { %468 = vsyncpa [#allocation3 + $0x1], 1 }
 0x24b   :  { %469 = vsyncpa [#allocation6], 1 }
 0x24c   :  { %471 = vsyncpa [#allocation6 + $0x1], 1 }
 0x24d   :  { %472 = vsyncpa [#allocation4], 1 }
 0x24e   :  { %474 = vsyncpa [#allocation4 + $0x1], 1 }
 0x24f   :  { %475 = vsyncpa [#allocation10], 1 }
 0x250   :  { %477 = vsyncpa [#allocation10 + $0x1], 1 }

</bundles_post_ra>
